<compile_context>
chip_gen: v7x
topology: tpu7x:2x2x1
jax: 0.10.0
libtpu: 0.0.40
codegen_flags: <defaults>
</compile_context>

<pallas_src>
import functools

import jax
import jax.numpy as jnp
from jax import lax
from jax.experimental import pallas as pl
from jax.experimental.pallas import tpu as pltpu

LN_EPS = 1e-5  # torch.nn.LayerNorm default


def _round_up(n, m):
    return ((n + m - 1) // m) * m


def _vmem_capacity_bytes():
    """Per-core VMEM capacity; conservative 64 MiB (v7x) fallback."""
    try:
        info = pltpu.get_tpu_info()
        cap = getattr(info, "vmem_capacity_bytes", None)
        if cap:
            return int(cap)
    except Exception:
        pass
    return 64 << 20


def _spec(block_shape, index_map, *, single_buffered=False):
    """BlockSpec; resident operands get pipeline_mode=pl.Buffered(1) when the
    running jax supports it (halves their VMEM reservation)."""
    if single_buffered and hasattr(pl, "Buffered"):
        try:
            return pl.BlockSpec(block_shape, index_map,
                                pipeline_mode=pl.Buffered(1))
        except TypeError:  # older jax without pipeline_mode kwarg
            pass
    return pl.BlockSpec(block_shape, index_map)


def linear_ln_kernel(x_ref, w_ref, b_ref, g_ref, beta_ref, o_ref, acc_ref, *,
                     d_out, d_out_p, inv_d):
    """One batch tile: y = x @ W_t (K-accumulated in f32) -> +bias -> LN -> ReLU."""
    k = pl.program_id(1)

    @pl.when(k == 0)
    def _():
        acc_ref[...] = jnp.zeros_like(acc_ref)

    # (tb, tk) x (tk, d_out_p) on the MXU, f32 accumulation, no operand upcast.
    acc_ref[...] += jnp.dot(x_ref[...], w_ref[...],
                            preferred_element_type=jnp.float32)

    @pl.when(k == pl.num_programs(1) - 1)
    def _():
        y = acc_ref[...] + b_ref[...].astype(jnp.float32)      # (tb, d_out_p)
        # Two-pass LayerNorm over the *real* d_out columns (padded weight /
        # bias columns are zero, so they do not perturb the mean).
        mean = jnp.sum(y, axis=-1, keepdims=True) * inv_d
        c = y - mean
        if d_out != d_out_p:
            col = lax.broadcasted_iota(jnp.int32, c.shape, 1)
            c = jnp.where(col < d_out, c, 0.0)                  # mask pad cols
        var = jnp.sum(c * c, axis=-1, keepdims=True) * inv_d    # biased var
        inv = lax.rsqrt(var + LN_EPS)
        out = c * inv * g_ref[...].astype(jnp.float32) \
            + beta_ref[...].astype(jnp.float32)
        o_ref[...] = jnp.maximum(out, 0.0).astype(o_ref.dtype)  # ReLU


def prepare_linear_ln_params(weight, bias, ln_weight, ln_bias, *,
                             compute_dtype=None, vmem_budget=None):
    """One-time parameter prep: transpose weight to (D_in, D_out_p), pad D_out
    to a lane-dense multiple of 128, pick the K tile (tk) so the weight slabs
    fit the per-chip VMEM budget. Call once, reuse across forward passes."""
    d_out, d_in = weight.shape
    d_out_p = _round_up(d_out, 128)
    pad_c = d_out_p - d_out

    w_t = weight.T                                   # (d_in, d_out)
    if compute_dtype is not None:
        w_t = w_t.astype(compute_dtype)              # e.g. bf16 MXU path (v5e)
    if pad_c:
        w_t = jnp.pad(w_t, ((0, 0), (0, pad_c)))
        bias = jnp.pad(bias, (0, pad_c))
        ln_weight = jnp.pad(ln_weight, (0, pad_c))
        ln_bias = jnp.pad(ln_bias, (0, pad_c))

    if vmem_budget is None:
        vmem_budget = int(_vmem_capacity_bytes() * 0.85)
    w_itm = w_t.dtype.itemsize
    weight_bytes = d_in * d_out_p * w_itm

    if weight_bytes <= vmem_budget // 2:
        # Weight stays fully VMEM-resident, single K step.
        tk, d_in_p = d_in, d_in
    else:
        # Stream the weight in double-buffered (tk, d_out_p) slabs over a
        # trailing K-reduction grid axis.
        tk = max(128, (vmem_budget // (4 * d_out_p * w_itm)) // 128 * 128)
        tk = min(tk, _round_up(d_in, 128))
        d_in_p = _round_up(d_in, tk)
        if d_in_p != d_in:
            w_t = jnp.pad(w_t, ((0, d_in_p - d_in), (0, 0)))
    num_k = d_in_p // tk

    return dict(
        w_t=w_t,
        bias=bias.reshape(1, d_out_p),
        gamma=ln_weight.reshape(1, d_out_p),
        beta=ln_bias.reshape(1, d_out_p),
        d_in=d_in, d_in_p=d_in_p, d_out=d_out, d_out_p=d_out_p,
        tk=tk, num_k=num_k,
    )


def linear_ln_apply(x, params, *, block_b=512, compute_dtype=None):
    batch, d_in = x.shape
    assert d_in == params["d_in"], "input feature dim mismatch"
    w_t, b2, g2, beta2 = params["w_t"], params["bias"], params["gamma"], params["beta"]
    d_out, d_out_p = params["d_out"], params["d_out_p"]
    d_in_p, tk, num_k = params["d_in_p"], params["tk"], params["num_k"]

    out_dtype = x.dtype
    if compute_dtype is not None:
        x = x.astype(compute_dtype)
    if d_in_p != d_in:                    # only in the K-streamed (huge-W) path
        x = jnp.pad(x, ((0, 0), (0, d_in_p - d_in)))

    x_itm = x.dtype.itemsize
    out_itm = jnp.dtype(out_dtype).itemsize
    w_itm = w_t.dtype.itemsize
    p_itm = b2.dtype.itemsize

    vmem_cap = _vmem_capacity_bytes()
    budget = int(vmem_cap * 0.85)

    # VMEM accounting: weight buffers, tiny param tiles, per-batch-row cost of
    # the streamed x / out tiles, the f32 accumulator and epilogue temps.
    weight_vmem = (1 if num_k == 1 else 2) * tk * d_out_p * w_itm
    param_vmem = 3 * 2 * d_out_p * p_itm
    per_row = (2 * tk * x_itm            # x tile (double-buffered)
               + 2 * d_out_p * out_itm   # out tile (double-buffered)
               + d_out_p * 4             # f32 accumulator scratch
               + 3 * d_out_p * 4)        # f32 epilogue intermediates
    avail = budget - weight_vmem - param_vmem
    tb_budget = 8 if avail <= 0 else max(8, (avail // per_row) // 8 * 8)

    batch_p8 = _round_up(batch, 8)
    tb = min(_round_up(block_b, 8), batch_p8, tb_budget)
    # v7x megacore: ensure >= 2 batch tiles whenever the batch allows it.
    if batch_p8 // tb <= 1 and batch_p8 >= 16:
        tb = min(tb, max(8, (batch_p8 // 2) // 8 * 8))

    batch_p = _round_up(batch, tb)
    if batch_p != batch:
        x = jnp.pad(x, ((0, batch_p - batch), (0, 0)))
    grid = (batch_p // tb, num_k)

    vmem_est = weight_vmem + param_vmem + tb * per_row
    vmem_limit = int(min(max(int(vmem_est * 1.3), 32 << 20), int(vmem_cap * 0.9)))

    cost = pl.CostEstimate(
        flops=2 * batch_p * d_in_p * d_out_p,
        transcendentals=batch_p,
        bytes_accessed=(batch_p * d_in_p * x_itm
                        + d_in_p * d_out_p * w_itm
                        + batch_p * d_out_p * out_itm),
    )

    kernel = functools.partial(linear_ln_kernel,
                               d_out=d_out, d_out_p=d_out_p, inv_d=1.0 / d_out)

    out = pl.pallas_call(
        kernel,
        out_shape=jax.ShapeDtypeStruct((batch_p, d_out_p), out_dtype),
        grid=grid,
        in_specs=[
            pl.BlockSpec((tb, tk), lambda i, k: (i, k)),                 # x
            _spec((tk, d_out_p), lambda i, k: (k, 0),
                  single_buffered=(num_k == 1)),                         # W^T
            _spec((1, d_out_p), lambda i, k: (0, 0), single_buffered=True),  # bias
            _spec((1, d_out_p), lambda i, k: (0, 0), single_buffered=True),  # gamma
            _spec((1, d_out_p), lambda i, k: (0, 0), single_buffered=True),  # beta
        ],
        out_specs=pl.BlockSpec((tb, d_out_p), lambda i, k: (i, 0)),
        scratch_shapes=[pltpu.VMEM((tb, d_out_p), jnp.float32)],
        compiler_params=pltpu.CompilerParams(
            dimension_semantics=("parallel", "arbitrary"),
            vmem_limit_bytes=vmem_limit,
        ),
        cost_estimate=cost,
    )(x, w_t, b2, g2, beta2)

    return out[:batch, :d_out]


def linear_ln_forward(x, weight, bias, ln_weight, ln_bias, *,
                      block_b=512, compute_dtype=None):
    """Convenience one-shot wrapper (prepare + apply). For repeated calls under
    jit, call prepare_linear_ln_params once and reuse the result."""
    params = prepare_linear_ln_params(weight, bias, ln_weight, ln_bias,
                                      compute_dtype=compute_dtype)
    return linear_ln_apply(x, params, block_b=block_b,
                           compute_dtype=compute_dtype)


def init_linear_ln_params(key, input_dim, output_dim, dtype=jnp.float32):
    """Matches LinearLN.__init__: fan_in_uniform_init on fc.weight (fan_in =
    input_dim) and fc.bias (fan_in = bias.size(-1) = output_dim); LN w=1, b=0."""
    kw, kb = jax.random.split(key)
    w_bound = 1.0 / (input_dim ** 0.5)
    b_bound = 1.0 / (output_dim ** 0.5)
    weight = jax.random.uniform(kw, (output_dim, input_dim), dtype,
                                minval=-w_bound, maxval=w_bound)
    bias = jax.random.uniform(kb, (output_dim,), dtype,
                              minval=-b_bound, maxval=b_bound)
    return weight, bias, jnp.ones((output_dim,), dtype), jnp.zeros((output_dim,), dtype)


def _reference(x, weight, bias, ln_w, ln_b):
    y = x @ weight.T + bias
    mean = y.mean(-1, keepdims=True)
    var = ((y - mean) ** 2).mean(-1, keepdims=True)
    return jnp.maximum((y - mean) / jnp.sqrt(var + LN_EPS) * ln_w + ln_b, 0.0)


if __name__ == "__main__":
    key = jax.random.PRNGKey(0)
    k_x, k_p, k_x2, k_p2 = jax.random.split(key, 4)

    # Case 1: MLP-sized layer, aligned batch.
    batch, input_dim, output_dim = 8, 32, 64
    x = jax.random.normal(k_x, (batch, input_dim), jnp.float32)
    w, b, lw, lb = init_linear_ln_params(k_p, input_dim, output_dim)
    out = jax.block_until_ready(linear_ln_forward(x, w, b, lw, lb))
    assert out.shape == (batch, output_dim)
    assert jnp.allclose(out, _reference(x, w, b, lw, lb), atol=1e-4, rtol=1e-4), \
        "mismatch vs reference (case 1)"

    # Case 2: ragged batch + non-128 D_out (exercises padding / masking / tiling).
    batch2, in2, out2 = 20, 48, 100
    x2 = jax.random.normal(k_x2, (batch2, in2), jnp.float32)
    w2, b2_, lw2, lb2 = init_linear_ln_params(k_p2, in2, out2)
    o2 = jax.block_until_ready(linear_ln_forward(x2, w2, b2_, lw2, lb2))
    assert o2.shape == (batch2, out2)
    assert jnp.allclose(o2, _reference(x2, w2, b2_, lw2, lb2), atol=1e-4, rtol=1e-4), \
        "mismatch vs reference (case 2)"

    print("KERNEL_OK")
</pallas_src>

<mosaic_0001>
module attributes {stable_mosaic.version = 11 : i64} {
  func.func @linear_ln_kernel(%arg0: i32, %arg1: i32, %arg2: memref<8x32xf32, #tpu.memory_space<vmem>>, %arg3: memref<32x128xf32, #tpu.memory_space<vmem>>, %arg4: memref<1x128xf32, #tpu.memory_space<vmem>>, %arg5: memref<1x128xf32, #tpu.memory_space<vmem>>, %arg6: memref<1x128xf32, #tpu.memory_space<vmem>>, %arg7: memref<8x128xf32, #tpu.memory_space<vmem>>, %arg8: memref<8x128xf32, #tpu.memory_space<vmem>>) attributes {dimension_semantics = [#tpu.dimension_semantics<parallel>, #tpu.dimension_semantics<arbitrary>], iteration_bounds = array<i64: 1, 1>, scalar_prefetch = 0 : i64, scratch_operands = 1 : i64, tpu.core_type = #tpu.core_type<tc>, window_params = [{transform_indices = @transform_0, window_bounds = array<i64: 8, 32>}, {pipeline_mode = #tpu.pipeline_mode<synchronous>, transform_indices = @transform_1, window_bounds = array<i64: 32, 128>}, {pipeline_mode = #tpu.pipeline_mode<synchronous>, transform_indices = @transform_2, window_bounds = array<i64: 1, 128>}, {pipeline_mode = #tpu.pipeline_mode<synchronous>, transform_indices = @transform_3, window_bounds = array<i64: 1, 128>}, {pipeline_mode = #tpu.pipeline_mode<synchronous>, transform_indices = @transform_4, window_bounds = array<i64: 1, 128>}, {transform_indices = @transform_5, window_bounds = array<i64: 8, 128>}]} {
    %c0_i32 = arith.constant 0 : i32
    %0 = arith.cmpi eq, %arg1, %c0_i32 : i32
    %1 = arith.extui %0 : i1 to i32
    %c0_i32_0 = arith.constant 0 : i32
    %2 = arith.cmpi ne, %1, %c0_i32_0 : i32
    scf.if %2 {
      %cst_10 = arith.constant 0.000000e+00 : f32
      %12 = vector.broadcast %cst_10 : f32 to vector<8x128xf32>
      %c0_11 = arith.constant 0 : index
      %c0_12 = arith.constant 0 : index
      %13 = vector.load %arg8[%c0_11, %c0_12] : memref<8x128xf32, #tpu.memory_space<vmem>>, vector<8x128xf32>
      tpu.vector_store %arg8[%c0_11, %c0_12], %12 {strides = array<i32>} : memref<8x128xf32, #tpu.memory_space<vmem>>, vector<8x128xf32>,
    } else {
    }
    %c0 = arith.constant 0 : index
    %c0_1 = arith.constant 0 : index
    %3 = vector.load %arg8[%c0, %c0_1] : memref<8x128xf32, #tpu.memory_space<vmem>>, vector<8x128xf32>
    %c0_2 = arith.constant 0 : index
    %c0_3 = arith.constant 0 : index
    %4 = vector.load %arg2[%c0_2, %c0_3] : memref<8x32xf32, #tpu.memory_space<vmem>>, vector<8x32xf32>
    %c0_4 = arith.constant 0 : index
    %c0_5 = arith.constant 0 : index
    %5 = vector.load %arg3[%c0_4, %c0_5] : memref<32x128xf32, #tpu.memory_space<vmem>>, vector<32x128xf32>
    %cst = arith.constant dense<0.000000e+00> : vector<8x128xf32>
    %6 = tpu.matmul %4, %5, %cst {dimension_numbers = #tpu.dot_dimension_numbers<[1], [0], [0], [1], [0, 0, 1, 1], [], []>} : vector<8x32xf32>, vector<32x128xf32>, vector<8x128xf32> -> vector<8x128xf32>
    %7 = arith.addf %3, %6 : vector<8x128xf32>
    %c0_6 = arith.constant 0 : index
    %c0_7 = arith.constant 0 : index
    %8 = vector.load %arg8[%c0_6, %c0_7] : memref<8x128xf32, #tpu.memory_space<vmem>>, vector<8x128xf32>
    tpu.vector_store %arg8[%c0_6, %c0_7], %7 {strides = array<i32>} : memref<8x128xf32, #tpu.memory_space<vmem>>, vector<8x128xf32>,
    %c0_i32_8 = arith.constant 0 : i32
    %9 = arith.cmpi eq, %arg1, %c0_i32_8 : i32
    %10 = arith.extui %9 : i1 to i32
    %c0_i32_9 = arith.constant 0 : i32
    %11 = arith.cmpi ne, %10, %c0_i32_9 : i32
    scf.if %11 {
      %c0_10 = arith.constant 0 : index
      %c0_11 = arith.constant 0 : index
      %12 = vector.load %arg8[%c0_10, %c0_11] : memref<8x128xf32, #tpu.memory_space<vmem>>, vector<8x128xf32>
      %c0_12 = arith.constant 0 : index
      %c0_13 = arith.constant 0 : index
      %13 = vector.load %arg4[%c0_12, %c0_13] : memref<1x128xf32, #tpu.memory_space<vmem>>, vector<1x128xf32>
      %14 = vector.broadcast %13 : vector<1x128xf32> to vector<8x128xf32>
      %15 = arith.addf %12, %14 : vector<8x128xf32>
      %cst_14 = arith.constant dense<0.000000e+00> : vector<8xf32>
      %16 = vector.multi_reduction <add>, %15, %cst_14 [1] : vector<8x128xf32> to vector<8xf32>
      %17 = vector.shape_cast %16 : vector<8xf32> to vector<8x1xf32>
      %cst_15 = arith.constant 1.562500e-02 : f32
      %18 = vector.broadcast %cst_15 : f32 to vector<8x1xf32>
      %19 = arith.mulf %17, %18 : vector<8x1xf32>
      %20 = vector.broadcast %19 : vector<8x1xf32> to vector<8x128xf32>
      %21 = arith.subf %15, %20 : vector<8x128xf32>
      %22 = tpu.iota {dimensions = array<i32: 1>} : vector<8x128xi32>
      %c64_i32 = arith.constant 64 : i32
      %23 = vector.broadcast %c64_i32 : i32 to vector<8x128xi32>
      %24 = arith.cmpi slt, %22, %23 : vector<8x128xi32>
      %cst_16 = arith.constant 0.000000e+00 : f32
      %25 = vector.broadcast %cst_16 : f32 to vector<8x128xf32>
      %26 = arith.select %24, %21, %25 : vector<8x128xi1>, vector<8x128xf32>
      %27 = arith.mulf %26, %26 : vector<8x128xf32>
      %cst_17 = arith.constant dense<0.000000e+00> : vector<8xf32>
      %28 = vector.multi_reduction <add>, %27, %cst_17 [1] : vector<8x128xf32> to vector<8xf32>
      %29 = vector.shape_cast %28 : vector<8xf32> to vector<8x1xf32>
      %cst_18 = arith.constant 1.562500e-02 : f32
      %30 = vector.broadcast %cst_18 : f32 to vector<8x1xf32>
      %31 = arith.mulf %29, %30 : vector<8x1xf32>
      %cst_19 = arith.constant 9.99999974E-6 : f32
      %32 = vector.broadcast %cst_19 : f32 to vector<8x1xf32>
      %33 = arith.addf %31, %32 : vector<8x1xf32>
      %34 = math.rsqrt %33 : vector<8x1xf32>
      %35 = vector.broadcast %34 : vector<8x1xf32> to vector<8x128xf32>
      %36 = arith.mulf %26, %35 : vector<8x128xf32>
      %c0_20 = arith.constant 0 : index
      %c0_21 = arith.constant 0 : index
      %37 = vector.load %arg5[%c0_20, %c0_21] : memref<1x128xf32, #tpu.memory_space<vmem>>, vector<1x128xf32>
      %38 = vector.broadcast %37 : vector<1x128xf32> to vector<8x128xf32>
      %39 = arith.mulf %36, %38 : vector<8x128xf32>
      %c0_22 = arith.constant 0 : index
      %c0_23 = arith.constant 0 : index
      %40 = vector.load %arg6[%c0_22, %c0_23] : memref<1x128xf32, #tpu.memory_space<vmem>>, vector<1x128xf32>
      %41 = vector.broadcast %40 : vector<1x128xf32> to vector<8x128xf32>
      %42 = arith.addf %39, %41 : vector<8x128xf32>
      %cst_24 = arith.constant 0.000000e+00 : f32
      %43 = vector.broadcast %cst_24 : f32 to vector<8x128xf32>
      %44 = arith.maximumf %42, %43 : vector<8x128xf32>
      %c0_25 = arith.constant 0 : index
      %c0_26 = arith.constant 0 : index
      %45 = vector.load %arg7[%c0_25, %c0_26] : memref<8x128xf32, #tpu.memory_space<vmem>>, vector<8x128xf32>
      tpu.vector_store %arg7[%c0_25, %c0_26], %44 {strides = array<i32>} : memref<8x128xf32, #tpu.memory_space<vmem>>, vector<8x128xf32>,
    } else {
    }
    return
  }
  func.func @transform_0(%arg0: i32, %arg1: i32) -> (i32, i32) {
    %c0_i32 = arith.constant 0 : i32
    return %arg0, %arg1 : i32, i32
  }
  func.func @transform_1(%arg0: i32, %arg1: i32) -> (i32, i32) {
    %c0_i32 = arith.constant 0 : i32
    %c0_i32_0 = arith.constant 0 : i32
    return %arg1, %c0_i32 : i32, i32
  }
  func.func @transform_2(%arg0: i32, %arg1: i32) -> (i32, i32) {
    %c0_i32 = arith.constant 0 : i32
    %c0_i32_0 = arith.constant 0 : i32
    %c0_i32_1 = arith.constant 0 : i32
    return %c0_i32, %c0_i32_0 : i32, i32
  }
  func.func @transform_3(%arg0: i32, %arg1: i32) -> (i32, i32) {
    %c0_i32 = arith.constant 0 : i32
    %c0_i32_0 = arith.constant 0 : i32
    %c0_i32_1 = arith.constant 0 : i32
    return %c0_i32, %c0_i32_0 : i32, i32
  }
  func.func @transform_4(%arg0: i32, %arg1: i32) -> (i32, i32) {
    %c0_i32 = arith.constant 0 : i32
    %c0_i32_0 = arith.constant 0 : i32
    %c0_i32_1 = arith.constant 0 : i32
    return %c0_i32, %c0_i32_0 : i32, i32
  }
  func.func @transform_5(%arg0: i32, %arg1: i32) -> (i32, i32) {
    %c0_i32 = arith.constant 0 : i32
    %c0_i32_0 = arith.constant 0 : i32
    return %arg0, %c0_i32 : i32, i32
  }
}

</mosaic_0001>

<bundles_post_ra>
// kernel: tpu_custom_call.1
= control target key start
LH: loop header
LB: loop body
LE: loop exit
PB: predicated region body
PF: predicated region fallthrough
CT: control target
= control target key end

     0   :  { %10 = vsyncpa [#allocation4], 0  ;;  %s393_s0 = inlined_call_operand.hbm [shape: f32[8,32], index: 0, kind: input, shape index: {}]   ;;  %s394_s1 = inlined_call_operand.hbm [shape: f32[32,128], index: 1, kind: input, shape index: {}]   ;;  %s395_s2 = inlined_call_operand.vmem [shape: f32[1,128], index: 2, kind: input, shape index: {}]   ;;  %s396_s3 = inlined_call_operand.vmem [shape: f32[1,128], index: 3, kind: input, shape index: {}]   ;;  %s397_s4 = inlined_call_operand.vmem [shape: f32[1,128], index: 4, kind: input, shape index: {}]   ;;  %s398_s5 = inlined_call_operand.hbm [shape: f32[8,128], index: 5, kind: output, shape index: {}]  }
   0x1   :  { %11 = vsyncpa [#allocation7], 0 }
   0x2   :  { %12 = vsyncpa [#allocation5], 0  ;;  %s303_s18 = smov [#allocation3]   ;;  %s304_s20 = smov [#allocation6]  }
   0x3   :  { %s19_s19 = sshll.u32 %s303_s18, 4  ;;  %s28_s21 = sshll.u32 %s304_s20, 4  ;;  %s20_s19 = int_to_ptr.vmem [resolvable:$true] %s19_s19  ;;  %s341_s21 = int_to_ptr.vmem [resolvable:$true] %s28_s21 }
   0x4   :  { %s231_s24 = scalar_lea.hbm %s393_s0, 128 }
   0x5   :  { %p232_p0 = scmp.ne.s32.totalorder %s393_s0, %s231_s24  ;;  %p235_p1 = scmp.lt.u32.totalorder %s231_s24, %s393_s0 }
   0x7   :  { %p237_p2 = pnand %p235_p1, %p232_p0 }
   0x9   :  { %240 = shalt.err (!%p237_p2)
}
   0xa   :  { %s241_s29 = scalar_lea.vmem %s20_s19, 128  ;;  %p246_p4 = scmp.lt.s32.totalorder %s20_s19, %s20_s19 }
   0xb   :  { %p242_p3 = scmp.ne.s32.totalorder %s20_s19, %s241_s29  ;;  %p247_p5 = scmp.lt.s32.totalorder %s241_s29, %s241_s29 }
   0xd   :  { %p248_p6 = por %p247_p5, %p246_p4 }
   0xf   :  { %p249_p7 = pnand %p248_p6, %p242_p3 }
  0x11   :  { %252 = shalt.err (!%p249_p7)
}
  0x12   :  { %22 = dma.hbm_to_vmem [thread:$0]  %s393_s0, 128, %s20_s19, [#allocation4]  }
  0x13   :  { %s253_s9 = scalar_lea.hbm %s394_s1, 512 }
  0x14   :  { %p254_p8 = scmp.ne.s32.totalorder %s394_s1, %s253_s9  ;;  %p257_p9 = scmp.lt.u32.totalorder %s253_s9, %s394_s1 }
  0x16   :  { %p259_p10 = pnand %p257_p9, %p254_p8 }
  0x18   :  { %262 = shalt.err (!%p259_p10)
}
  0x19   :  { %s263_s14 = scalar_lea.vmem %s341_s21, 512  ;;  %p268_p12 = scmp.lt.s32.totalorder %s341_s21, %s341_s21 }
  0x1a   :  { %p264_p11 = scmp.ne.s32.totalorder %s341_s21, %s263_s14  ;;  %p269_p13 = scmp.lt.s32.totalorder %s263_s14, %s263_s14 }
  0x1c   :  { %p270_p0 = por %p269_p13, %p268_p12 }
  0x1e   :  { %p271_p1 = pnand %p270_p0, %p264_p11 }
  0x20   :  { %274 = shalt.err (!%p271_p1)
}
  0x21   :  { %s305_s0 = smov 128   ;;  %s306_s15 = smov 8  }
  0x22   :  { %34 = dma.hbm_to_vmem [thread:$0]  %s394_s1, 512, %s341_s21, [#allocation7], %s305_s0, %s305_s0, %s306_s15  }
  0x23   :  { %297 = dma.done.wait [#allocation4], 128  }
  0x24   :  { %298 = vsyncadd [#allocation4], 4294967168 }
  0x25   :  { %299 = dma.done.wait [#allocation7], 512  }
  0x26   :  { %300 = vsyncadd [#allocation7], 4294966784  ;;  %v307_v0 = vmov 0.0|0.0   ;;  %vm308_vm0 = vmmov 0   ;;  %v309_v1 = vmov 0.0   ;;  %v54_v2 = vld [vmem:[#allocation6] sm:$0xff]  ;;  %v150_v13 = vlaneseq }
  0x27   :  { %215 = vmatprep.subr.bf16.mxu0 %v307_v0  ;;  %212 = vmatprep.mubr.msk.f32.mxu0 %vm308_vm0, %v309_v1  ;;  %v55_v3 = vld [vmem:[#allocation6 + $0x8] sm:$0xff]  ;;  %v56_v4 = vld [vmem:[#allocation6 + $0x10] sm:$0xff]  ;;  %v57_v6 = vld [vmem:[#allocation6 + $0x18] sm:$0xff]  ;;  %vm58_vm1 = vcmask 261120   ;;  %s310_s22 = smov [#allocation8]  }
  0x28   :  { %v216_v5 = vpack.c.bf16 %v55_v3, %v54_v2  ;;  %v219_v7 = vpack.c.bf16 %v57_v6, %v56_v4  ;;  %v53_v8 = vld [vmem:[#allocation3] sm:$0xff]  ;;  %v151_v14 = vand.u32 127, %v150_v13  ;;  %s185_s23 = sshll.u32 %s310_s22, 4  ;;  %s186_s23 = int_to_ptr.vmem [resolvable:$true] %s185_s23 }
  0x29   :  { %v196_v9 = vld [vmem:[%s395_s2] ss:$0 sm:$0xff]  ;;  %s275_s24 = scalar_lea.vmem %s186_s23, 128  ;;  %p280_p3 = scmp.lt.s32.totalorder %s186_s23, %s186_s23 }
  0x2a   :  { %217 = vmatpush3.bf16.msra.mxu0 %v216_v5  ;;  %vm152_vm2 = vcmp.lt.s32.totalorder %v151_v14, 64  ;;  %v197_v24 = vld [vmem:[%s396_s3] ss:$0 sm:$0xff]  ;;  %p276_p2 = scmp.ne.s32.totalorder %s186_s23, %s275_s24  ;;  %p281_p4 = scmp.lt.s32.totalorder %s275_s24, %s275_s24 }
  0x2b   :  { %218 = vmatprep.subr.bf16.mxu0 %v307_v0  ;;  %v198_v26 = vld [vmem:[%s397_s4] ss:$0 sm:$0xff] }
  0x2c   :  { %p282_p5 = por %p281_p4, %p280_p3 }
  0x2e   :  { %220 = vmatpush3.bf16.msra.mxu0 %v219_v7  ;;  %p283_p6 = pnand %p282_p5, %p276_p2 }
  0x31   :  { %213 = vmatmul.mubr.msk.f32.vlgmr.msra.gmra.mrb[0].mxu0 %vm58_vm1, %v53_v8 }
 0x104   :  { %v128_v10 = vpop.f32.mrb[0].mxu0 }
 0x105   :  { %v145_v11 = vadd.f32 %v196_v9, %v128_v10  ;;  %v214_v12 = vpop.f32.mrb[1].mxu0 }
 0x107   :  { %146 = vadd.xlane.f32.xlu0 %v145_v11 }
 0x194   :  { %v147_v15 = vpop.xlane.xlu0 %146 }
 0x195   :  { %v148_v16 = vmul.f32 0.015625, %v147_v15 }
 0x197   :  { %v149_v17 = vsub.f32 %v145_v11, %v148_v16 }
 0x199   :  { %v153_v18 = vsel %vm152_vm2, %v149_v17, 0.0 }
 0x19a   :  { %v154_v19 = vmul.f32 %v153_v18, %v153_v18 }
 0x19c   :  { %155 = vadd.xlane.f32.xlu0 %v154_v19 }
 0x229   :  { %v156_v20 = vpop.xlane.xlu0 %155 }
 0x22a   :  { %v157_v21 = vmul.f32 0.015625, %v156_v20 }
 0x22c   :  { %v158_v22 = vadd.f32 1e-05, %v157_v21 }
 0x22e   :  { %229 = vrsqrt.f32 %v158_v22 }
 0x238   :  { %v230_v23 = vpop.eup %229 }
 0x239   :  { %v160_v25 = vmul.f32 %v230_v23, %v153_v18 }
 0x23b   :  { %v168_v27 = vmul.f32 %v197_v24, %v160_v25 }
 0x23d   :  { %v176_v28 = vadd.f32 %v198_v26, %v168_v27 }
 0x23f   :  { %v177_v29 = vmax.f32 %v176_v28, 0.0 }
 0x241   :  { %178 = vst [vmem:[#allocation8] sm:$0xff] %v177_v29 }
 0x242   :  { %286 = shalt.err (!%p283_p6)
}
 0x243   :  { %s287_s26 = scalar_lea.hbm %s398_s5, 128 }
 0x244   :  { %p288_p7 = scmp.ne.s32.totalorder %s398_s5, %s287_s26  ;;  %p291_p8 = scmp.lt.u32.totalorder %s287_s26, %s398_s5 }
 0x246   :  { %p293_p9 = pnand %p291_p8, %p288_p7 }
 0x248   :  { %296 = shalt.err (!%p293_p9)
}
 0x249   :  { %188 = dma.vmem_to_hbm [thread:$0]  %s186_s23, 128, %s398_s5, [#allocation5]  }
 0x24a   :  { %301 = dma.done.wait [#allocation5], 128  }
 0x24b   :  { %302 = vsyncadd [#allocation5], 4294967168 }
 0x24c   :  { %192 = vsyncpa [#allocation4], 1 }
 0x24d   :  { %193 = vsyncpa [#allocation7], 1 }
 0x24e   :  { %194 = vsyncpa [#allocation5], 1 }

</bundles_post_ra>
